<compile_context>
chip_gen: v7x
topology: tpu7x:2x2x1
jax: 0.10.0
libtpu: 0.0.40
codegen_flags: <defaults>
</compile_context>

<pallas_src>
import math

import jax
import jax.numpy as jnp
from jax.experimental import pallas as pl
from jax.experimental.pallas import tpu as pltpu

_LANES = 128
_SUBLANES = 8
_TILE_BYTE_BUDGET = 4 << 20  # 4 MiB/output tile; x2 buffers fits every gen's scoped VMEM


def _scale_kernel(bias_ref, scale_ref):
    # exp evaluated on the (1, L) bias row only (EUP work independent of batch),
    # then broadcast along sublanes and stored with full-lane vst.
    s = jnp.exp(bias_ref[...])                          # (1, L)
    scale_ref[...] = jnp.broadcast_to(s, scale_ref.shape)


def _round_up(x, m):
    return ((x + m - 1) // m) * m


def _row_tile(rows, lanes, itemsize):
    """Rows per output block.

    Multiple of 8 (or == rows when rows <= 8 so block == full dim), sized to the
    VMEM byte budget, and capped so the grid has >= 2 steps when the array is big
    enough (v7x megacore: the 'parallel' axis is split across 2 TensorCores).
    """
    if rows <= _SUBLANES:
        return rows
    budget = max(
        _SUBLANES,
        (_TILE_BYTE_BUDGET // (lanes * itemsize)) // _SUBLANES * _SUBLANES,
    )
    half = _round_up(pl.cdiv(rows, 2), _SUBLANES)
    return max(_SUBLANES, min(budget, half, _round_up(rows, _SUBLANES)))


def _broadcast_exp(bias_row, rows, lanes):
    """pallas_call producing exp(bias_row) broadcast to a (rows, lanes) array."""
    itemsize = bias_row.dtype.itemsize
    tb = _row_tile(rows, lanes, itemsize)
    grid = (pl.cdiv(rows, tb),)
    return pl.pallas_call(
        _scale_kernel,
        out_shape=jax.ShapeDtypeStruct((rows, lanes), bias_row.dtype),
        grid=grid,
        # Constant block index -> the (1, lanes) bias row is DMA'd once.
        in_specs=[pl.BlockSpec((1, lanes), lambda i: (0, 0))],
        out_specs=pl.BlockSpec((tb, lanes), lambda i: (i, 0)),
        compiler_params=pltpu.CompilerParams(
            dimension_semantics=("parallel",),
        ),
        cost_estimate=pl.CostEstimate(
            flops=0,
            transcendentals=lanes,
            bytes_accessed=(rows * lanes + lanes) * itemsize,
        ),
    )(bias_row)


def diag_gaussian_forward(action_mean, logstd_bias, *, min_pallas_elements=1 << 15):
    """Returns (loc, scale) of the diagonal Gaussian.

    action_mean: (B, A) float
    logstd_bias: (A,)   float  -- the AddBias parameter (filled with `noise`)
    """
    B, A = action_mean.shape
    dtype = action_mean.dtype

    # loc IS the mean: never round-trip it through HBM via the kernel.
    loc = action_mean
    bias = logstd_bias.astype(dtype)

    # Small-shape bypass: kernel launch + pipeline overhead dominates below
    # ~10^5 elements; a plain broadcast of the exp'd (A,) row is cheaper (and a
    # downstream sample/log_prob kernel can fuse from that row without ever
    # materializing the (B, A) scale).
    if B * A < min_pallas_elements:
        return loc, jnp.broadcast_to(jnp.exp(bias)[None, :], (B, A))

    period = (A * _LANES) // math.gcd(A, _LANES)  # lcm(A, 128), in elements
    if (B * A) % period == 0:  # equivalent to (B*A) % 128 == 0
        # Lane-dense path for ANY A: view the flat output as (B*A/P, P).  Every
        # row of that view equals the length-P periodic pattern exp(bias[k % A]),
        # so the kernel is a pure sublane broadcast with unmasked 128-lane stores.
        lanes = period
        rows = (B * A) // lanes
        bias_row = jnp.tile(bias, lanes // A).reshape(1, lanes)
        scale = _broadcast_exp(bias_row, rows, lanes).reshape(B, A)
    else:
        # Fallback (B*A not a multiple of 128): lane dim = A (full-dim block is
        # legal; stores are masked).  Rows still tiled in multiples of 8 so a
        # large B never becomes a single full-array VMEM block.
        bias_row = bias.reshape(1, A)
        scale = _broadcast_exp(bias_row, B, A)

    # TODO(synk): torch.distributions.Normal object construction has no Pallas
    # equivalent; callers should build the distribution from (loc, scale).
    return loc, scale


def _reference(action_mean, logstd_bias):
    zeros = jnp.zeros_like(action_mean)
    return action_mean, jnp.exp(zeros + logstd_bias[None, :].astype(action_mean.dtype))


if __name__ == "__main__":
    key = jax.random.PRNGKey(0)
    noise = -1.5  # DiagGaussian default

    # (B, A) cases: A | 128 (fast path), A=6 with B*A%128==0 (generalized
    # lane-dense path), and a non-multiple-of-128 fallback case.
    cases = [(8, 32), (64, 6), (5, 6)]
    for (B, A) in cases:
        key, sub = jax.random.split(key)
        logstd_bias = jnp.full((A,), noise, dtype=jnp.float32)
        action_mean = jax.random.normal(sub, (B, A), dtype=jnp.float32)

        # Force the Pallas path even at these small demo shapes.
        loc, scale = diag_gaussian_forward(
            action_mean, logstd_bias, min_pallas_elements=0
        )
        jax.block_until_ready((loc, scale))

        ref_loc, ref_scale = _reference(action_mean, logstd_bias)
        assert bool(jnp.allclose(loc, ref_loc, atol=1e-6)), (B, A)
        assert bool(jnp.allclose(scale, ref_scale, atol=1e-6, rtol=1e-6)), (B, A)

    # Default small-shape bypass path (no kernel launch) is also correct.
    B, A = 8, 32
    key, sub = jax.random.split(key)
    logstd_bias = jnp.full((A,), noise, dtype=jnp.float32)
    action_mean = jax.random.normal(sub, (B, A), dtype=jnp.float32)
    loc, scale = diag_gaussian_forward(action_mean, logstd_bias)
    jax.block_until_ready((loc, scale))
    ref_loc, ref_scale = _reference(action_mean, logstd_bias)
    assert bool(jnp.allclose(loc, ref_loc, atol=1e-6))
    assert bool(jnp.allclose(scale, ref_scale, atol=1e-6, rtol=1e-6))

    print("KERNEL_OK")
</pallas_src>

<mosaic_0001>
module attributes {stable_mosaic.version = 11 : i64} {
  func.func @_scale_kernel(%arg0: i32, %arg1: memref<1x128xf32, #tpu.memory_space<vmem>>, %arg2: memref<2x128xf32, #tpu.memory_space<vmem>>) attributes {dimension_semantics = [#tpu.dimension_semantics<parallel>], iteration_bounds = array<i64: 1>, scalar_prefetch = 0 : i64, scratch_operands = 0 : i64, tpu.core_type = #tpu.core_type<tc>, window_params = [{pipeline_mode = #tpu.pipeline_mode<synchronous>, transform_indices = @transform_0, window_bounds = array<i64: 1, 128>}, {transform_indices = @transform_1, window_bounds = array<i64: 2, 128>}]} {
    %c0 = arith.constant 0 : index
    %c0_0 = arith.constant 0 : index
    %0 = vector.load %arg1[%c0, %c0_0] : memref<1x128xf32, #tpu.memory_space<vmem>>, vector<1x128xf32>
    %1 = math.exp %0 : vector<1x128xf32>
    %2 = vector.shape_cast %1 : vector<1x128xf32> to vector<1x128xf32>
    %3 = vector.broadcast %2 : vector<1x128xf32> to vector<2x128xf32>
    %c0_1 = arith.constant 0 : index
    %c0_2 = arith.constant 0 : index
    %4 = vector.load %arg2[%c0_1, %c0_2] : memref<2x128xf32, #tpu.memory_space<vmem>>, vector<2x128xf32>
    tpu.vector_store %arg2[%c0_1, %c0_2], %3 {strides = array<i32>} : memref<2x128xf32, #tpu.memory_space<vmem>>, vector<2x128xf32>,
    return
  }
  func.func @transform_0(%arg0: i32) -> (i32, i32) {
    %c0_i32 = arith.constant 0 : i32
    %c0_i32_0 = arith.constant 0 : i32
    %c0_i32_1 = arith.constant 0 : i32
    return %c0_i32, %c0_i32_0 : i32, i32
  }
  func.func @transform_1(%arg0: i32) -> (i32, i32) {
    %c0_i32 = arith.constant 0 : i32
    %c0_i32_0 = arith.constant 0 : i32
    return %arg0, %c0_i32 : i32, i32
  }
}

</mosaic_0001>

<bundles_post_ra>
// kernel: tpu_custom_call.1
= control target key start
LH: loop header
LB: loop body
LE: loop exit
PB: predicated region body
PF: predicated region fallthrough
CT: control target
= control target key end

     0   :  { %6 = vsyncpa [#allocation3], 0  ;;  %s134_s0 = inlined_call_operand.hbm [shape: f32[1,128], index: 0, kind: input, shape index: {}]   ;;  %s135_s1 = inlined_call_operand.hbm [shape: f32[2,128], index: 1, kind: output, shape index: {}]  }
   0x1   :  { %7 = vsyncpa [#allocation4], 0  ;;  %s98_s6 = smov [#allocation2]   ;;  %s50_s10 = scalar_lea.hbm %s134_s0, 16 }
   0x2   :  { %s14_s7 = sshll.u32 %s98_s6, 4  ;;  %p51_p0 = scmp.ne.s32.totalorder %s134_s0, %s50_s10  ;;  %s15_s7 = int_to_ptr.vmem [resolvable:$true] %s14_s7 }
   0x3   :  { %p54_p1 = scmp.lt.u32.totalorder %s50_s10, %s134_s0 }
   0x5   :  { %p56_p2 = pnand %p54_p1, %p51_p0 }
   0x7   :  { %59 = shalt.err (!%p56_p2)
}
   0x8   :  { %s60_s15 = scalar_lea.vmem %s15_s7, 16  ;;  %s64_s16 = scalar_lea.vmem %s15_s7, 32 }
   0x9   :  { %p61_p3 = scmp.ne.s32.totalorder %s15_s7, %s60_s15  ;;  %p65_p4 = scmp.lt.s32.totalorder %s15_s7, %s15_s7 }
   0xa   :  { %p66_p5 = scmp.lt.s32.totalorder %s64_s16, %s60_s15 }
   0xc   :  { %p67_p6 = por %p66_p5, %p65_p4 }
   0xe   :  { %p68_p7 = pnand %p67_p6, %p61_p3 }
  0x10   :  { %71 = shalt.err (!%p68_p7)
}
  0x11   :  { %17 = dma.hbm_to_vmem [thread:$0]  %s134_s0, 16, %s15_s7, [#allocation3]  }
  0x12   :  { %94 = dma.done.wait [#allocation3], 16  }
  0x13   :  { %95 = vsyncadd [#allocation3], 4294967280  ;;  %v21_v0 = vld [vmem:[#allocation2] sm:$0x1]  ;;  %v25_v2 = vlaneseq  ;;  %s99_s19 = smov [#allocation5]  }
  0x14   :  { %v22_v1 = vmul.f32 1.442695, %v21_v0  ;;  %s37_s20 = sshll.u32 %s99_s19, 4  ;;  %s38_s20 = int_to_ptr.vmem [resolvable:$true] %s37_s20 }
  0x15   :  { %v26_v3 = vshrl.u32 %v25_v2, 7  ;;  %s72_s21 = scalar_lea.vmem %s38_s20, 32  ;;  %p77_p9 = scmp.lt.s32.totalorder %s38_s20, %s38_s20 }
  0x16   :  { %48 = vpow2.f32 %v22_v1  ;;  %p73_p8 = scmp.ne.s32.totalorder %s38_s20, %s72_s21  ;;  %p78_p10 = scmp.lt.s32.totalorder %s72_s21, %s72_s21 }
  0x17   :  { %v27_v4 = vsub.s32 0, %v26_v3 }
  0x18   :  { %p79_p11 = por %p78_p10, %p77_p9 }
  0x1a   :  { %p80_p12 = pnand %p79_p11, %p73_p8 }
  0x20   :  { %v49_v5 = vpop.eup %48 }
  0x21   :  { %v28_v6 = vrot.slane %v49_v5, %v27_v4 }
  0x23   :  { %30 = vst [vmem:[#allocation5] sm:$0x3] %v28_v6 }
  0x24   :  { %83 = shalt.err (!%p80_p12)
}
  0x25   :  { %s84_s23 = scalar_lea.hbm %s135_s1, 32 }
  0x26   :  { %p85_p13 = scmp.ne.s32.totalorder %s135_s1, %s84_s23  ;;  %p88_p0 = scmp.lt.u32.totalorder %s84_s23, %s135_s1 }
  0x28   :  { %p90_p1 = pnand %p88_p0, %p85_p13 }
  0x2a   :  { %93 = shalt.err (!%p90_p1)
}
  0x2b   :  { %40 = dma.vmem_to_hbm [thread:$0]  %s38_s20, 32, %s135_s1, [#allocation4]  }
  0x2c   :  { %96 = dma.done.wait [#allocation4], 32  }
  0x2d   :  { %97 = vsyncadd [#allocation4], 4294967264 }
  0x2e   :  { %44 = vsyncpa [#allocation3], 1 }
  0x2f   :  { %45 = vsyncpa [#allocation4], 1 }

</bundles_post_ra>
